<compile_context>
chip_gen: v6e
topology: v6e:2x2x1
jax: 0.10.0
libtpu: 0.0.40
codegen_flags: <defaults>
</compile_context>

<pallas_src>
import functools

import jax
import jax.numpy as jnp
from jax.experimental import pallas as pl
from jax.experimental.pallas import tpu as pltpu

LAMBDA_NO_OBJ = 0.5
LAMBDA_COORD = 5.0


def _round_up(x, m):
    return ((x + m - 1) // m) * m


def _cdiv(a, b):
    return (a + b - 1) // b


def _yolo_loss_kernel(pred_ref, tgt_ref, out_ref, *, num_boxes, num_classes):
    """pred_ref: (P, R, 128), tgt_ref: (T, R, 128), out_ref: (1, 128) lane partials."""

    def prow(r):                       # dense (R, 128) tile for one pred channel
        return pred_ref[r].astype(jnp.float32)

    def trow(r):                       # dense (R, 128) tile for one target channel
        return tgt_ref[r].astype(jnp.float32)

    # Target box / objectness.
    tx, ty, tw, th = trow(0), trow(1), trow(2), trow(3)
    obj = trow(4)

    t_x1 = tx - tw * 0.5
    t_y1 = ty - th * 0.5
    t_x2 = tx + tw * 0.5
    t_y2 = ty + th * 0.5
    area_t = jnp.abs((t_x2 - t_x1) * (t_y2 - t_y1))

    def iou(px, py, pw, ph):
        p_x1 = px - pw * 0.5
        p_y1 = py - ph * 0.5
        p_x2 = px + pw * 0.5
        p_y2 = py + ph * 0.5
        ix = jnp.maximum(jnp.minimum(p_x2, t_x2) - jnp.maximum(p_x1, t_x1), 0.0)
        iy = jnp.maximum(jnp.minimum(p_y2, t_y2) - jnp.maximum(p_y1, t_y1), 0.0)
        inter = ix * iy
        area_p = jnp.abs((p_x2 - p_x1) * (p_y2 - p_y1))
        # Exact divide kept: approx reciprocal risks the 1e-4 check and, after
        # the dense relayout, the kernel is memory-bound so the divide is free.
        return inter / (area_p + area_t - inter + 1e-6)

    iou1 = iou(prow(0), prow(1), prow(2), prow(3))
    iou2 = iou(prow(5), prow(6), prow(7), prow(8))
    # torch.max(dim=0) picks box 2 only if strictly greater.
    best_is_b2 = iou2 > iou1                                        # (R, 128) bool

    # Responsible box (x, y, w, h, conf) per cell.
    sel_x = jnp.where(best_is_b2, prow(5), prow(0))
    sel_y = jnp.where(best_is_b2, prow(6), prow(1))
    sel_w = jnp.where(best_is_b2, prow(7), prow(2))
    sel_h = jnp.where(best_is_b2, prow(8), prow(3))
    sel_c = jnp.where(best_is_b2, prow(9), prow(4))

    # --- class loss: dense (C, R, 128) squared diff reduced over the leading
    #     (non-minor) class axis -> full-vreg adds, no lane-sparse serial chain. ---
    cls0 = num_boxes * 5
    cdiff = (pred_ref[cls0:cls0 + num_classes].astype(jnp.float32)
             - tgt_ref[5:5 + num_classes].astype(jnp.float32))
    class_se = jnp.sum(cdiff * cdiff, axis=0)                       # (R, 128)

    # --- detection (confidence) loss ---
    det_w = LAMBDA_NO_OBJ * (1.0 - obj) + obj
    det_se = det_w * (obj - sel_c) ** 2

    # --- bbox coordinate loss (sqrt on w, h) ---
    # TODO(synk): like the torch reference, sqrt of a negative predicted w/h gives
    # NaN (canonical fix is sign(x)*sqrt(|x|+eps)); kept as-is to preserve
    # forward semantics.
    bbox_se = (sel_x - tx) ** 2 + (sel_y - ty) ** 2 + \
              (jnp.sqrt(sel_w) - jnp.sqrt(tw)) ** 2 + (jnp.sqrt(sel_h) - jnp.sqrt(th)) ** 2

    # Fused per-cell loss; one cross-sublane reduce per tile -> (1, 128) partials.
    per_cell = obj * (class_se + LAMBDA_COORD * bbox_se) + det_se   # (R, 128)
    out_ref[...] = jnp.sum(per_cell, axis=0, keepdims=True)


def yolo_v1_loss(predictions, target, *, grid_size, num_boxes, num_classes, tile_m=8192):
    """Pallas implementation of YoloV1Loss.forward (num_boxes must be 2, as in the reference)."""
    assert num_boxes == 2, "reference loss only ever uses 2 boxes (iou_b1, iou_b2)"
    S, B, C = grid_size, num_boxes, num_classes
    P = B * 5 + C
    T = 5 + C

    pred2d = predictions.reshape(-1, P)            # (M, P), free reshape
    tgt2d = target.reshape(-1, T)                  # (M, T), free reshape
    M = pred2d.shape[0]
    assert tgt2d.shape[0] == M

    # Tile selection: one grid step for typical YOLO sizes (M = batch*49).  Only
    # very large M tiles, with tm a multiple of 1024 (so R = tm/128 is a
    # multiple of 8) sized to minimize zero-pad waste.
    n_tiles = max(1, _cdiv(M, tile_m))
    if n_tiles == 1:
        tm = _round_up(M, 128)
    else:
        tm = _round_up(_cdiv(M, n_tiles), 1024)
    m_pad = _round_up(M, tm)
    n_tiles = m_pad // tm
    R = tm // 128

    # Channel-major dense relayout: channels -> leading dim, cells -> (sublane, lane).
    # Single cheap XLA pass over <1 MiB of data; input dtype (f32 or bf16) is
    # preserved here and upcast inside the kernel (halves ingest bytes for bf16).
    pred_t = pred2d.T                              # (P, M)
    tgt_t = tgt2d.T                                # (T, M)
    if m_pad != M:
        # Zero padding contributes exactly 0 to every loss term (obj = conf = 0).
        pred_t = jnp.pad(pred_t, ((0, 0), (0, m_pad - M)))
        tgt_t = jnp.pad(tgt_t, ((0, 0), (0, m_pad - M)))
    pred_t = pred_t.reshape(P, m_pad // 128, 128)
    tgt_t = tgt_t.reshape(T, m_pad // 128, 128)

    kernel = functools.partial(_yolo_loss_kernel, num_boxes=B, num_classes=C)

    cost = pl.CostEstimate(
        flops=int(160 * m_pad),
        transcendentals=int(6 * m_pad),
        bytes_accessed=int((P * jnp.dtype(pred_t.dtype).itemsize
                            + T * jnp.dtype(tgt_t.dtype).itemsize) * m_pad
                           + 4 * 128 * n_tiles),
    )

    partials = pl.pallas_call(
        kernel,
        out_shape=jax.ShapeDtypeStruct((1, n_tiles * 128), jnp.float32),
        grid=(n_tiles,),
        in_specs=[
            pl.BlockSpec((P, R, 128), lambda i: (0, i, 0)),
            pl.BlockSpec((T, R, 128), lambda i: (0, i, 0)),
        ],
        out_specs=pl.BlockSpec((1, 128), lambda i: (0, i)),
        compiler_params=pltpu.CompilerParams(
            dimension_semantics=("parallel",),
        ),
        cost_estimate=cost,
    )(pred_t, tgt_t)
    # Tiny final reduction of the per-tile lane partials.
    return jnp.sum(partials)


# ----------------------------------------------------------------------------
# Pure-JAX reference mirroring the PyTorch forward (for the correctness check).
# ----------------------------------------------------------------------------
def _iou_midpoint(box1, box2):
    b1_x1 = box1[:, 0:1] - box1[:, 2:3] * 0.5
    b1_y1 = box1[:, 1:2] - box1[:, 3:4] * 0.5
    b1_x2 = box1[:, 0:1] + box1[:, 2:3] * 0.5
    b1_y2 = box1[:, 1:2] + box1[:, 3:4] * 0.5
    b2_x1 = box2[:, 0:1] - box2[:, 2:3] * 0.5
    b2_y1 = box2[:, 1:2] - box2[:, 3:4] * 0.5
    b2_x2 = box2[:, 0:1] + box2[:, 2:3] * 0.5
    b2_y2 = box2[:, 1:2] + box2[:, 3:4] * 0.5

    x1 = jnp.maximum(b1_x1, b2_x1)
    y1 = jnp.maximum(b1_y1, b2_y1)
    x2 = jnp.minimum(b1_x2, b2_x2)
    y2 = jnp.minimum(b1_y2, b2_y2)

    inter = jnp.maximum(x2 - x1, 0.0) * jnp.maximum(y2 - y1, 0.0)
    area1 = jnp.abs((b1_x2 - b1_x1) * (b1_y2 - b1_y1))
    area2 = jnp.abs((b2_x2 - b2_x1) * (b2_y2 - b2_y1))
    return inter / (area1 + area2 - inter + 1e-6)


def _reference_loss(predictions, target, *, grid_size, num_boxes, num_classes):
    S, B, C = grid_size, num_boxes, num_classes
    P = B * 5 + C
    pred = predictions.reshape(-1, S, S, P).astype(jnp.float32)
    tgt = target.astype(jnp.float32)

    iou1 = _iou_midpoint(pred[..., 0:4].reshape(-1, 4), tgt[..., 0:4].reshape(-1, 4))
    iou2 = _iou_midpoint(pred[..., 5:9].reshape(-1, 4), tgt[..., 0:4].reshape(-1, 4))
    best_is_b2 = (iou2 > iou1).reshape(pred.shape[:3] + (1,))

    selected = jnp.where(best_is_b2, pred[..., 5:10], pred[..., 0:5])
    obj = tgt[..., 4]

    class_loss = jnp.sum(obj * jnp.sum((pred[..., B * 5:] - tgt[..., 5:]) ** 2, axis=-1))
    det_w = LAMBDA_NO_OBJ * (1.0 - obj) + obj
    det_loss = jnp.sum(det_w * (obj - selected[..., 4]) ** 2)

    sel_box = jnp.concatenate([selected[..., 0:2], jnp.sqrt(selected[..., 2:4])], axis=-1)
    tgt_box = jnp.concatenate([tgt[..., 0:2], jnp.sqrt(tgt[..., 2:4])], axis=-1)
    bbox_loss = jnp.sum(obj * jnp.sum((sel_box - tgt_box) ** 2, axis=-1))

    return class_loss + det_loss + LAMBDA_COORD * bbox_loss


if __name__ == "__main__":
    GRID_SIZE = 7
    NUM_BOXES = 2
    NUM_CLASSES = 20
    BATCH = 2
    P = NUM_BOXES * 5 + NUM_CLASSES           # 30
    T = 5 + NUM_CLASSES                       # 25

    key = jax.random.PRNGKey(0)
    k_pred, k_tgt, k_obj = jax.random.split(key, 3)

    predictions = jax.random.uniform(
        k_pred, (BATCH, GRID_SIZE * GRID_SIZE * P), dtype=jnp.float32, minval=0.05, maxval=1.0)
    target = jax.random.uniform(
        k_tgt, (BATCH, GRID_SIZE, GRID_SIZE, T), dtype=jnp.float32, minval=0.05, maxval=1.0)
    obj_mask = (jax.random.uniform(k_obj, (BATCH, GRID_SIZE, GRID_SIZE)) > 0.5).astype(jnp.float32)
    target = target.at[..., 4].set(obj_mask)

    loss_fn = jax.jit(functools.partial(
        yolo_v1_loss, grid_size=GRID_SIZE, num_boxes=NUM_BOXES, num_classes=NUM_CLASSES))
    loss = jax.block_until_ready(loss_fn(predictions, target))

    ref = jax.block_until_ready(_reference_loss(
        predictions, target,
        grid_size=GRID_SIZE, num_boxes=NUM_BOXES, num_classes=NUM_CLASSES))

    assert jnp.allclose(loss, ref, rtol=1e-4, atol=1e-4), (loss, ref)
    print("KERNEL_OK")
</pallas_src>

<mosaic_0001>
module attributes {stable_mosaic.version = 11 : i64} {
  func.func @_yolo_loss_kernel(%arg0: i32, %arg1: memref<30x1x128xf32, #tpu.memory_space<vmem>>, %arg2: memref<25x1x128xf32, #tpu.memory_space<vmem>>, %arg3: memref<1x128xf32, #tpu.memory_space<vmem>>) attributes {dimension_semantics = [#tpu.dimension_semantics<parallel>], iteration_bounds = array<i64: 1>, scalar_prefetch = 0 : i64, scratch_operands = 0 : i64, tpu.core_type = #tpu.core_type<tc>, window_params = [{transform_indices = @transform_0, window_bounds = array<i64: 30, 1, 128>}, {transform_indices = @transform_1, window_bounds = array<i64: 25, 1, 128>}, {transform_indices = @transform_2, window_bounds = array<i64: 1, 128>}]} {
    %c0 = arith.constant 0 : index
    %c0_0 = arith.constant 0 : index
    %c0_1 = arith.constant 0 : index
    %0 = vector.load %arg2[%c0, %c0_0, %c0_1] : memref<25x1x128xf32, #tpu.memory_space<vmem>>, vector<1x1x128xf32>
    %1 = vector.shape_cast %0 : vector<1x1x128xf32> to vector<1x128xf32>
    %c1 = arith.constant 1 : index
    %c0_2 = arith.constant 0 : index
    %c0_3 = arith.constant 0 : index
    %2 = vector.load %arg2[%c1, %c0_2, %c0_3] : memref<25x1x128xf32, #tpu.memory_space<vmem>>, vector<1x1x128xf32>
    %3 = vector.shape_cast %2 : vector<1x1x128xf32> to vector<1x128xf32>
    %c2 = arith.constant 2 : index
    %c0_4 = arith.constant 0 : index
    %c0_5 = arith.constant 0 : index
    %4 = vector.load %arg2[%c2, %c0_4, %c0_5] : memref<25x1x128xf32, #tpu.memory_space<vmem>>, vector<1x1x128xf32>
    %5 = vector.shape_cast %4 : vector<1x1x128xf32> to vector<1x128xf32>
    %c3 = arith.constant 3 : index
    %c0_6 = arith.constant 0 : index
    %c0_7 = arith.constant 0 : index
    %6 = vector.load %arg2[%c3, %c0_6, %c0_7] : memref<25x1x128xf32, #tpu.memory_space<vmem>>, vector<1x1x128xf32>
    %7 = vector.shape_cast %6 : vector<1x1x128xf32> to vector<1x128xf32>
    %c4 = arith.constant 4 : index
    %c0_8 = arith.constant 0 : index
    %c0_9 = arith.constant 0 : index
    %8 = vector.load %arg2[%c4, %c0_8, %c0_9] : memref<25x1x128xf32, #tpu.memory_space<vmem>>, vector<1x1x128xf32>
    %9 = vector.shape_cast %8 : vector<1x1x128xf32> to vector<1x128xf32>
    %cst = arith.constant 5.000000e-01 : f32
    %10 = vector.broadcast %cst : f32 to vector<1x128xf32>
    %11 = arith.mulf %5, %10 : vector<1x128xf32>
    %12 = arith.subf %1, %11 : vector<1x128xf32>
    %cst_10 = arith.constant 5.000000e-01 : f32
    %13 = vector.broadcast %cst_10 : f32 to vector<1x128xf32>
    %14 = arith.mulf %7, %13 : vector<1x128xf32>
    %15 = arith.subf %3, %14 : vector<1x128xf32>
    %cst_11 = arith.constant 5.000000e-01 : f32
    %16 = vector.broadcast %cst_11 : f32 to vector<1x128xf32>
    %17 = arith.mulf %5, %16 : vector<1x128xf32>
    %18 = arith.addf %1, %17 : vector<1x128xf32>
    %cst_12 = arith.constant 5.000000e-01 : f32
    %19 = vector.broadcast %cst_12 : f32 to vector<1x128xf32>
    %20 = arith.mulf %7, %19 : vector<1x128xf32>
    %21 = arith.addf %3, %20 : vector<1x128xf32>
    %22 = arith.subf %18, %12 : vector<1x128xf32>
    %23 = arith.subf %21, %15 : vector<1x128xf32>
    %24 = arith.mulf %22, %23 : vector<1x128xf32>
    %25 = math.absf %24 : vector<1x128xf32>
    %c0_13 = arith.constant 0 : index
    %c0_14 = arith.constant 0 : index
    %c0_15 = arith.constant 0 : index
    %26 = vector.load %arg1[%c0_13, %c0_14, %c0_15] : memref<30x1x128xf32, #tpu.memory_space<vmem>>, vector<1x1x128xf32>
    %27 = vector.shape_cast %26 : vector<1x1x128xf32> to vector<1x128xf32>
    %c1_16 = arith.constant 1 : index
    %c0_17 = arith.constant 0 : index
    %c0_18 = arith.constant 0 : index
    %28 = vector.load %arg1[%c1_16, %c0_17, %c0_18] : memref<30x1x128xf32, #tpu.memory_space<vmem>>, vector<1x1x128xf32>
    %29 = vector.shape_cast %28 : vector<1x1x128xf32> to vector<1x128xf32>
    %c2_19 = arith.constant 2 : index
    %c0_20 = arith.constant 0 : index
    %c0_21 = arith.constant 0 : index
    %30 = vector.load %arg1[%c2_19, %c0_20, %c0_21] : memref<30x1x128xf32, #tpu.memory_space<vmem>>, vector<1x1x128xf32>
    %31 = vector.shape_cast %30 : vector<1x1x128xf32> to vector<1x128xf32>
    %c3_22 = arith.constant 3 : index
    %c0_23 = arith.constant 0 : index
    %c0_24 = arith.constant 0 : index
    %32 = vector.load %arg1[%c3_22, %c0_23, %c0_24] : memref<30x1x128xf32, #tpu.memory_space<vmem>>, vector<1x1x128xf32>
    %33 = vector.shape_cast %32 : vector<1x1x128xf32> to vector<1x128xf32>
    %cst_25 = arith.constant 5.000000e-01 : f32
    %34 = vector.broadcast %cst_25 : f32 to vector<1x128xf32>
    %35 = arith.mulf %31, %34 : vector<1x128xf32>
    %36 = arith.subf %27, %35 : vector<1x128xf32>
    %cst_26 = arith.constant 5.000000e-01 : f32
    %37 = vector.broadcast %cst_26 : f32 to vector<1x128xf32>
    %38 = arith.mulf %33, %37 : vector<1x128xf32>
    %39 = arith.subf %29, %38 : vector<1x128xf32>
    %cst_27 = arith.constant 5.000000e-01 : f32
    %40 = vector.broadcast %cst_27 : f32 to vector<1x128xf32>
    %41 = arith.mulf %31, %40 : vector<1x128xf32>
    %42 = arith.addf %27, %41 : vector<1x128xf32>
    %cst_28 = arith.constant 5.000000e-01 : f32
    %43 = vector.broadcast %cst_28 : f32 to vector<1x128xf32>
    %44 = arith.mulf %33, %43 : vector<1x128xf32>
    %45 = arith.addf %29, %44 : vector<1x128xf32>
    %46 = arith.minimumf %42, %18 : vector<1x128xf32>
    %47 = arith.maximumf %36, %12 : vector<1x128xf32>
    %48 = arith.subf %46, %47 : vector<1x128xf32>
    %cst_29 = arith.constant 0.000000e+00 : f32
    %49 = vector.broadcast %cst_29 : f32 to vector<1x128xf32>
    %50 = arith.maximumf %48, %49 : vector<1x128xf32>
    %51 = arith.minimumf %45, %21 : vector<1x128xf32>
    %52 = arith.maximumf %39, %15 : vector<1x128xf32>
    %53 = arith.subf %51, %52 : vector<1x128xf32>
    %cst_30 = arith.constant 0.000000e+00 : f32
    %54 = vector.broadcast %cst_30 : f32 to vector<1x128xf32>
    %55 = arith.maximumf %53, %54 : vector<1x128xf32>
    %56 = arith.mulf %50, %55 : vector<1x128xf32>
    %57 = arith.subf %42, %36 : vector<1x128xf32>
    %58 = arith.subf %45, %39 : vector<1x128xf32>
    %59 = arith.mulf %57, %58 : vector<1x128xf32>
    %60 = math.absf %59 : vector<1x128xf32>
    %61 = arith.addf %60, %25 : vector<1x128xf32>
    %62 = arith.subf %61, %56 : vector<1x128xf32>
    %cst_31 = arith.constant 9.99999997E-7 : f32
    %63 = vector.broadcast %cst_31 : f32 to vector<1x128xf32>
    %64 = arith.addf %62, %63 : vector<1x128xf32>
    %65 = arith.divf %56, %64 : vector<1x128xf32>
    %c5 = arith.constant 5 : index
    %c0_32 = arith.constant 0 : index
    %c0_33 = arith.constant 0 : index
    %66 = vector.load %arg1[%c5, %c0_32, %c0_33] : memref<30x1x128xf32, #tpu.memory_space<vmem>>, vector<1x1x128xf32>
    %67 = vector.shape_cast %66 : vector<1x1x128xf32> to vector<1x128xf32>
    %c6 = arith.constant 6 : index
    %c0_34 = arith.constant 0 : index
    %c0_35 = arith.constant 0 : index
    %68 = vector.load %arg1[%c6, %c0_34, %c0_35] : memref<30x1x128xf32, #tpu.memory_space<vmem>>, vector<1x1x128xf32>
    %69 = vector.shape_cast %68 : vector<1x1x128xf32> to vector<1x128xf32>
    %c7 = arith.constant 7 : index
    %c0_36 = arith.constant 0 : index
    %c0_37 = arith.constant 0 : index
    %70 = vector.load %arg1[%c7, %c0_36, %c0_37] : memref<30x1x128xf32, #tpu.memory_space<vmem>>, vector<1x1x128xf32>
    %71 = vector.shape_cast %70 : vector<1x1x128xf32> to vector<1x128xf32>
    %c8 = arith.constant 8 : index
    %c0_38 = arith.constant 0 : index
    %c0_39 = arith.constant 0 : index
    %72 = vector.load %arg1[%c8, %c0_38, %c0_39] : memref<30x1x128xf32, #tpu.memory_space<vmem>>, vector<1x1x128xf32>
    %73 = vector.shape_cast %72 : vector<1x1x128xf32> to vector<1x128xf32>
    %cst_40 = arith.constant 5.000000e-01 : f32
    %74 = vector.broadcast %cst_40 : f32 to vector<1x128xf32>
    %75 = arith.mulf %71, %74 : vector<1x128xf32>
    %76 = arith.subf %67, %75 : vector<1x128xf32>
    %cst_41 = arith.constant 5.000000e-01 : f32
    %77 = vector.broadcast %cst_41 : f32 to vector<1x128xf32>
    %78 = arith.mulf %73, %77 : vector<1x128xf32>
    %79 = arith.subf %69, %78 : vector<1x128xf32>
    %cst_42 = arith.constant 5.000000e-01 : f32
    %80 = vector.broadcast %cst_42 : f32 to vector<1x128xf32>
    %81 = arith.mulf %71, %80 : vector<1x128xf32>
    %82 = arith.addf %67, %81 : vector<1x128xf32>
    %cst_43 = arith.constant 5.000000e-01 : f32
    %83 = vector.broadcast %cst_43 : f32 to vector<1x128xf32>
    %84 = arith.mulf %73, %83 : vector<1x128xf32>
    %85 = arith.addf %69, %84 : vector<1x128xf32>
    %86 = arith.minimumf %82, %18 : vector<1x128xf32>
    %87 = arith.maximumf %76, %12 : vector<1x128xf32>
    %88 = arith.subf %86, %87 : vector<1x128xf32>
    %cst_44 = arith.constant 0.000000e+00 : f32
    %89 = vector.broadcast %cst_44 : f32 to vector<1x128xf32>
    %90 = arith.maximumf %88, %89 : vector<1x128xf32>
    %91 = arith.minimumf %85, %21 : vector<1x128xf32>
    %92 = arith.maximumf %79, %15 : vector<1x128xf32>
    %93 = arith.subf %91, %92 : vector<1x128xf32>
    %cst_45 = arith.constant 0.000000e+00 : f32
    %94 = vector.broadcast %cst_45 : f32 to vector<1x128xf32>
    %95 = arith.maximumf %93, %94 : vector<1x128xf32>
    %96 = arith.mulf %90, %95 : vector<1x128xf32>
    %97 = arith.subf %82, %76 : vector<1x128xf32>
    %98 = arith.subf %85, %79 : vector<1x128xf32>
    %99 = arith.mulf %97, %98 : vector<1x128xf32>
    %100 = math.absf %99 : vector<1x128xf32>
    %101 = arith.addf %100, %25 : vector<1x128xf32>
    %102 = arith.subf %101, %96 : vector<1x128xf32>
    %cst_46 = arith.constant 9.99999997E-7 : f32
    %103 = vector.broadcast %cst_46 : f32 to vector<1x128xf32>
    %104 = arith.addf %102, %103 : vector<1x128xf32>
    %105 = arith.divf %96, %104 : vector<1x128xf32>
    %106 = arith.cmpf ogt, %105, %65 : vector<1x128xf32>
    %c5_47 = arith.constant 5 : index
    %c0_48 = arith.constant 0 : index
    %c0_49 = arith.constant 0 : index
    %107 = vector.load %arg1[%c5_47, %c0_48, %c0_49] : memref<30x1x128xf32, #tpu.memory_space<vmem>>, vector<1x1x128xf32>
    %108 = vector.shape_cast %107 : vector<1x1x128xf32> to vector<1x128xf32>
    %c0_50 = arith.constant 0 : index
    %c0_51 = arith.constant 0 : index
    %c0_52 = arith.constant 0 : index
    %109 = vector.load %arg1[%c0_50, %c0_51, %c0_52] : memref<30x1x128xf32, #tpu.memory_space<vmem>>, vector<1x1x128xf32>
    %110 = vector.shape_cast %109 : vector<1x1x128xf32> to vector<1x128xf32>
    %111 = arith.select %106, %108, %110 : vector<1x128xi1>, vector<1x128xf32>
    %c6_53 = arith.constant 6 : index
    %c0_54 = arith.constant 0 : index
    %c0_55 = arith.constant 0 : index
    %112 = vector.load %arg1[%c6_53, %c0_54, %c0_55] : memref<30x1x128xf32, #tpu.memory_space<vmem>>, vector<1x1x128xf32>
    %113 = vector.shape_cast %112 : vector<1x1x128xf32> to vector<1x128xf32>
    %c1_56 = arith.constant 1 : index
    %c0_57 = arith.constant 0 : index
    %c0_58 = arith.constant 0 : index
    %114 = vector.load %arg1[%c1_56, %c0_57, %c0_58] : memref<30x1x128xf32, #tpu.memory_space<vmem>>, vector<1x1x128xf32>
    %115 = vector.shape_cast %114 : vector<1x1x128xf32> to vector<1x128xf32>
    %116 = arith.select %106, %113, %115 : vector<1x128xi1>, vector<1x128xf32>
    %c7_59 = arith.constant 7 : index
    %c0_60 = arith.constant 0 : index
    %c0_61 = arith.constant 0 : index
    %117 = vector.load %arg1[%c7_59, %c0_60, %c0_61] : memref<30x1x128xf32, #tpu.memory_space<vmem>>, vector<1x1x128xf32>
    %118 = vector.shape_cast %117 : vector<1x1x128xf32> to vector<1x128xf32>
    %c2_62 = arith.constant 2 : index
    %c0_63 = arith.constant 0 : index
    %c0_64 = arith.constant 0 : index
    %119 = vector.load %arg1[%c2_62, %c0_63, %c0_64] : memref<30x1x128xf32, #tpu.memory_space<vmem>>, vector<1x1x128xf32>
    %120 = vector.shape_cast %119 : vector<1x1x128xf32> to vector<1x128xf32>
    %121 = arith.select %106, %118, %120 : vector<1x128xi1>, vector<1x128xf32>
    %c8_65 = arith.constant 8 : index
    %c0_66 = arith.constant 0 : index
    %c0_67 = arith.constant 0 : index
    %122 = vector.load %arg1[%c8_65, %c0_66, %c0_67] : memref<30x1x128xf32, #tpu.memory_space<vmem>>, vector<1x1x128xf32>
    %123 = vector.shape_cast %122 : vector<1x1x128xf32> to vector<1x128xf32>
    %c3_68 = arith.constant 3 : index
    %c0_69 = arith.constant 0 : index
    %c0_70 = arith.constant 0 : index
    %124 = vector.load %arg1[%c3_68, %c0_69, %c0_70] : memref<30x1x128xf32, #tpu.memory_space<vmem>>, vector<1x1x128xf32>
    %125 = vector.shape_cast %124 : vector<1x1x128xf32> to vector<1x128xf32>
    %126 = arith.select %106, %123, %125 : vector<1x128xi1>, vector<1x128xf32>
    %c9 = arith.constant 9 : index
    %c0_71 = arith.constant 0 : index
    %c0_72 = arith.constant 0 : index
    %127 = vector.load %arg1[%c9, %c0_71, %c0_72] : memref<30x1x128xf32, #tpu.memory_space<vmem>>, vector<1x1x128xf32>
    %128 = vector.shape_cast %127 : vector<1x1x128xf32> to vector<1x128xf32>
    %c4_73 = arith.constant 4 : index
    %c0_74 = arith.constant 0 : index
    %c0_75 = arith.constant 0 : index
    %129 = vector.load %arg1[%c4_73, %c0_74, %c0_75] : memref<30x1x128xf32, #tpu.memory_space<vmem>>, vector<1x1x128xf32>
    %130 = vector.shape_cast %129 : vector<1x1x128xf32> to vector<1x128xf32>
    %131 = arith.select %106, %128, %130 : vector<1x128xi1>, vector<1x128xf32>
    %c10 = arith.constant 10 : index
    %c0_76 = arith.constant 0 : index
    %c0_77 = arith.constant 0 : index
    %132 = vector.load %arg1[%c10, %c0_76, %c0_77] : memref<30x1x128xf32, #tpu.memory_space<vmem>>, vector<20x1x128xf32>
    %c5_78 = arith.constant 5 : index
    %c0_79 = arith.constant 0 : index
    %c0_80 = arith.constant 0 : index
    %133 = vector.load %arg2[%c5_78, %c0_79, %c0_80] : memref<25x1x128xf32, #tpu.memory_space<vmem>>, vector<20x1x128xf32>
    %134 = arith.subf %132, %133 : vector<20x1x128xf32>
    %135 = arith.mulf %134, %134 : vector<20x1x128xf32>
    %cst_81 = arith.constant dense<0.000000e+00> : vector<1x128xf32>
    %136 = vector.multi_reduction <add>, %135, %cst_81 [0] : vector<20x1x128xf32> to vector<1x128xf32>
    %cst_82 = arith.constant 1.000000e+00 : f32
    %137 = vector.broadcast %cst_82 : f32 to vector<1x128xf32>
    %138 = arith.subf %137, %9 : vector<1x128xf32>
    %cst_83 = arith.constant 5.000000e-01 : f32
    %139 = vector.broadcast %cst_83 : f32 to vector<1x128xf32>
    %140 = arith.mulf %139, %138 : vector<1x128xf32>
    %141 = arith.addf %140, %9 : vector<1x128xf32>
    %142 = arith.subf %9, %131 : vector<1x128xf32>
    %143 = arith.mulf %142, %142 : vector<1x128xf32>
    %144 = arith.mulf %141, %143 : vector<1x128xf32>
    %145 = arith.subf %111, %1 : vector<1x128xf32>
    %146 = arith.mulf %145, %145 : vector<1x128xf32>
    %147 = arith.subf %116, %3 : vector<1x128xf32>
    %148 = arith.mulf %147, %147 : vector<1x128xf32>
    %149 = arith.addf %146, %148 : vector<1x128xf32>
    %150 = math.sqrt %121 : vector<1x128xf32>
    %151 = math.sqrt %5 : vector<1x128xf32>
    %152 = arith.subf %150, %151 : vector<1x128xf32>
    %153 = arith.mulf %152, %152 : vector<1x128xf32>
    %154 = arith.addf %149, %153 : vector<1x128xf32>
    %155 = math.sqrt %126 : vector<1x128xf32>
    %156 = math.sqrt %7 : vector<1x128xf32>
    %157 = arith.subf %155, %156 : vector<1x128xf32>
    %158 = arith.mulf %157, %157 : vector<1x128xf32>
    %159 = arith.addf %154, %158 : vector<1x128xf32>
    %cst_84 = arith.constant 5.000000e+00 : f32
    %160 = vector.broadcast %cst_84 : f32 to vector<1x128xf32>
    %161 = arith.mulf %160, %159 : vector<1x128xf32>
    %162 = arith.addf %136, %161 : vector<1x128xf32>
    %163 = arith.mulf %9, %162 : vector<1x128xf32>
    %164 = arith.addf %163, %144 : vector<1x128xf32>
    %cst_85 = arith.constant dense<0.000000e+00> : vector<128xf32>
    %165 = vector.multi_reduction <add>, %164, %cst_85 [0] : vector<1x128xf32> to vector<128xf32>
    %166 = vector.shape_cast %165 : vector<128xf32> to vector<1x128xf32>
    %c0_86 = arith.constant 0 : index
    %c0_87 = arith.constant 0 : index
    %167 = vector.load %arg3[%c0_86, %c0_87] : memref<1x128xf32, #tpu.memory_space<vmem>>, vector<1x128xf32>
    tpu.vector_store %arg3[%c0_86, %c0_87], %166 {strides = array<i32>} : memref<1x128xf32, #tpu.memory_space<vmem>>, vector<1x128xf32>,
    return
  }
  func.func @transform_0(%arg0: i32) -> (i32, i32, i32) {
    %c0_i32 = arith.constant 0 : i32
    %c0_i32_0 = arith.constant 0 : i32
    %c0_i32_1 = arith.constant 0 : i32
    return %c0_i32, %arg0, %c0_i32_0 : i32, i32, i32
  }
  func.func @transform_1(%arg0: i32) -> (i32, i32, i32) {
    %c0_i32 = arith.constant 0 : i32
    %c0_i32_0 = arith.constant 0 : i32
    %c0_i32_1 = arith.constant 0 : i32
    return %c0_i32, %arg0, %c0_i32_0 : i32, i32, i32
  }
  func.func @transform_2(%arg0: i32) -> (i32, i32) {
    %c0_i32 = arith.constant 0 : i32
    %c0_i32_0 = arith.constant 0 : i32
    return %c0_i32, %arg0 : i32, i32
  }
}

</mosaic_0001>

<bundles_post_ra>
// kernel: yolo_v1_loss.1
= control target key start
LH: loop header
LB: loop body
LE: loop exit
PB: predicated region body
PF: predicated region fallthrough
CT: control target
= control target key end

     0   :  { %vm185_vm0 = vcmask 1040384   ;;  %s662_s1 = inlined_call_operand.vmem [shape: f32[25,1,128], index: 1, kind: input, shape index: {}]   ;;  %s663_s0 = inlined_call_operand.vmem [shape: f32[30,1,128], index: 0, kind: input, shape index: {}]   ;;  %s664_s2 = inlined_call_operand.vmem [shape: f32[1,128], index: 2, kind: output, shape index: {}]  }
   0x1   :  { %v363_v0 = vld [vmem:[%s662_s1] sm:$0x1]  ;;  %v368_v1 = vld [vmem:[%s662_s1 + $0x2] sm:$0x1]  ;;  %v373_v2 = vld [vmem:[%s662_s1 + $0x1] sm:$0x1] }
   0x2   :  { %v378_v3 = vld [vmem:[%s662_s1 + $0x3] sm:$0x1]  ;;  %v20_v4 = vmul.f32 0.5, %v368_v1  ;;  %v385_v6 = vld [vmem:[%s663_s0] sm:$0x1]  ;;  %vm245_vm2 = vcmp.eq.f32.partialorder %v368_v1, inf }
   0x3   :  { %v22_v5 = vmul.f32 0.5, %v378_v3  ;;  %v392_v9 = vld [vmem:[%s663_s0 + $0x1] sm:$0x1]  ;;  %v397_v10 = vld [vmem:[%s663_s0 + $0x2] sm:$0x1]  ;;  %vm262_vm3 = vcmp.eq.f32.partialorder %v378_v3, inf }
   0x4   :  { %v21_v7 = vsub.f32 %v363_v0, %v20_v4  ;;  %v24_v8 = vadd.f32 %v20_v4, %v363_v0  ;;  %v402_v11 = vld [vmem:[%s663_s0 + $0x3] sm:$0x1]  ;;  %v37_v14 = vmul.f32 0.5, %v397_v10  ;;  %v411_v16 = vld [vmem:[%s663_s0 + $0x5] sm:$0x1]  ;;  %vm247_vm4 = vcmp.eq.f32.partialorder %v368_v1, 0.0 }
   0x5   :  { %v23_v12 = vsub.f32 %v373_v2, %v22_v5  ;;  %v25_v13 = vadd.f32 %v373_v2, %v22_v5  ;;  %v39_v15 = vmul.f32 0.5, %v402_v11  ;;  %v416_v17 = vld [vmem:[%s663_s0 + $0x7] sm:$0x1]  ;;  %v421_v19 = vld [vmem:[%s663_s0 + $0x8] sm:$0x1]  ;;  %vm264_vm5 = vcmp.eq.f32.partialorder %v378_v3, 0.0 }
   0x6   :  { %v26_v18 = vsub.f32 %v24_v8, %v21_v7  ;;  %v69_v20 = vmul.f32 0.5, %v416_v17  ;;  %v38_v22 = vsub.f32 %v385_v6, %v37_v14  ;;  %v41_v24 = vadd.f32 %v37_v14, %v385_v6  ;;  %v430_v25 = vld [vmem:[%s663_s0 + $0x6] sm:$0x1]  ;;  %v293_v60 = vld [vmem:[%s663_s0 + $0xa] sm:$0x1] }
   0x7   :  { %v27_v21 = vsub.f32 %v25_v13, %v23_v12  ;;  %v40_v23 = vsub.f32 %v392_v9, %v39_v15  ;;  %v42_v26 = vadd.f32 %v392_v9, %v39_v15  ;;  %v71_v28 = vmul.f32 0.5, %v421_v19  ;;  %v294_v62 = vld [vmem:[%s663_s0 + $0xb] sm:$0x1]  ;;  %v313_v63 = vld [vmem:[%s662_s1 + $0x5] sm:$0x1] }
   0x8   :  { %v70_v27 = vsub.f32 %v411_v16, %v69_v20  ;;  %v73_v29 = vadd.f32 %v411_v16, %v69_v20  ;;  %v43_v31 = vmin.f32 %v41_v24, %v24_v8  ;;  %v44_v32 = vmax.f32 %v38_v22, %v21_v7  ;;  %v314_v4 = vld [vmem:[%s662_s1 + $0x6] sm:$0x1]  ;;  %v296_v14 = vld [vmem:[%s663_s0 + $0xd] sm:$0x1]  ;;  %v316_v15 = vld [vmem:[%s662_s1 + $0x8] sm:$0x1] }
   0x9   :  { %v28_v30 = vmul.f32 %v27_v21, %v26_v18  ;;  %v48_v33 = vmax.f32 %v40_v23, %v23_v12  ;;  %v47_v34 = vmin.f32 %v42_v26, %v25_v13  ;;  %v52_v35 = vsub.f32 %v41_v24, %v38_v22  ;;  %v297_v22 = vld [vmem:[%s663_s0 + $0xe] sm:$0x1] }
   0xa   :  { %v53_v36 = vsub.f32 %v42_v26, %v40_v23  ;;  %v72_v37 = vsub.f32 %v430_v25, %v71_v28  ;;  %v45_v39 = vsub.f32 %v43_v31, %v44_v32  ;;  %v74_v40 = vadd.f32 %v430_v25, %v71_v28  ;;  %v317_v23 = vld [vmem:[%s662_s1 + $0x9] sm:$0x1]  ;;  %v298_v28 = vld [vmem:[%s663_s0 + $0xf] sm:$0x1] }
   0xb   :  { %v29_v38 = vand.u32 2147483647, %v28_v30  ;;  %v75_v41 = vmin.f32 %v73_v29, %v24_v8  ;;  %v49_v42 = vsub.f32 %v47_v34, %v48_v33  ;;  %v76_v44 = vmax.f32 %v70_v27, %v21_v7  ;;  %v295_v8 = vld [vmem:[%s663_s0 + $0xc] sm:$0x1]  ;;  %v299_v33 = vld [vmem:[%s663_s0 + $0x10] sm:$0x1] }
   0xc   :  { %v54_v43 = vmul.f32 %v53_v36, %v52_v35  ;;  %v80_v45 = vmax.f32 %v72_v37, %v23_v12  ;;  %v46_v46 = vmax.f32 %v45_v39, 0.0  ;;  %v79_v47 = vmin.f32 %v74_v40, %v25_v13  ;;  %v315_v12 = vld [vmem:[%s662_s1 + $0x7] sm:$0x1]  ;;  %v319_v34 = vld [vmem:[%s662_s1 + $0xb] sm:$0x1] }
   0xd   :  { %v84_v48 = vsub.f32 %v73_v29, %v70_v27  ;;  %v85_v49 = vsub.f32 %v74_v40, %v72_v37  ;;  %v50_v50 = vmax.f32 %v49_v42, 0.0  ;;  %v77_v52 = vsub.f32 %v75_v41, %v76_v44  ;;  %v318_v29 = vld [vmem:[%s662_s1 + $0xa] sm:$0x1]  ;;  %v320_v39 = vld [vmem:[%s662_s1 + $0xc] sm:$0x1] }
   0xe   :  { %v55_v51 = vand.u32 2147483647, %v54_v43  ;;  %v81_v53 = vsub.f32 %v79_v47, %v80_v45  ;;  %v145_v20 = vsub.f32 %v293_v60, %v313_v63  ;;  %v146_v21 = vsub.f32 %v294_v62, %v314_v4  ;;  %v321_v47 = vld [vmem:[%s662_s1 + $0xd] sm:$0x1]  ;;  %v303_v60 = vld [vmem:[%s663_s0 + $0x14] sm:$0x1] }
   0xf   :  { %v86_v54 = vmul.f32 %v85_v49, %v84_v48  ;;  %v438_v55 = vmul.f32 %v50_v50, %v46_v46  ;;  %v78_v57 = vmax.f32 %v77_v52, 0.0  ;;  %v147_v24 = vsub.f32 %v295_v8, %v315_v12  ;;  %v301_v46 = vld [vmem:[%s663_s0 + $0x12] sm:$0x1]  ;;  %v302_v52 = vld [vmem:[%s663_s0 + $0x13] sm:$0x1] }
  0x10   :  { %v56_v56 = vadd.f32 %v55_v51, %v29_v38  ;;  %v82_v58 = vmax.f32 %v81_v53, 0.0  ;;  %v148_v27 = vsub.f32 %v296_v14, %v316_v15  ;;  %v149_v30 = vsub.f32 %v297_v22, %v317_v23  ;;  %v322_v53 = vld [vmem:[%s662_s1 + $0xe] sm:$0x1]  ;;  %v304_v12 = vld [vmem:[%s663_s0 + $0x15] sm:$0x1] }
  0x11   :  { %v87_v59 = vand.u32 2147483647, %v86_v54  ;;  %v165_v31 = vmul.f32 %v145_v20, %v145_v20  ;;  %v166_v32 = vmul.f32 %v146_v21, %v146_v21  ;;  %v167_v35 = vmul.f32 %v147_v24, %v147_v24  ;;  %v325_v23 = vld [vmem:[%s662_s1 + $0x11] sm:$0x1] }
  0x12   :  { %v57_v61 = vsub.f32 %v56_v56, %v438_v55  ;;  %v453_v5 = vmul.f32 %v82_v58, %v78_v57  ;;  %v150_v36 = vsub.f32 %v298_v28, %v318_v29  ;;  %v168_v37 = vmul.f32 %v148_v27, %v148_v27 }
  0x13   :  { %v88_v7 = vadd.f32 %v87_v59, %v29_v38  ;;  %v300_v38 = vld [vmem:[%s663_s0 + $0x11] sm:$0x1]  ;;  %v151_v40 = vsub.f32 %v299_v33, %v319_v34  ;;  %v169_v41 = vmul.f32 %v149_v30, %v149_v30  ;;  %v186_v42 = vsel %vm185_vm0, %v165_v31, 0.0  ;;  %v326_v30 = vld [vmem:[%s662_s1 + $0x12] sm:$0x1] }
  0x14   :  { %v58_v13 = vadd.f32 1e-06, %v57_v61  ;;  %v187_v43 = vsel %vm185_vm0, %v166_v32, 0.0  ;;  %v189_v45 = vsel %vm185_vm0, %v167_v35, 0.0  ;;  %v170_v48 = vmul.f32 %v150_v36, %v150_v36  ;;  %v323_v61 = vld [vmem:[%s662_s1 + $0xf] sm:$0x1] }
  0x15   :  { %v89_v18 = vsub.f32 %v88_v7, %v453_v5  ;;  %v188_v44 = vadd.f32 %v187_v43, %v186_v42  ;;  %v191_v49 = vsel %vm185_vm0, %v168_v37, 0.0  ;;  %v152_v50 = vsub.f32 %v300_v38, %v320_v39  ;;  %v307_v32 = vld [vmem:[%s663_s0 + $0x18] sm:$0x1]  ;;  %v327_v33 = vld [vmem:[%s662_s1 + $0x13] sm:$0x1] }
  0x16   :  { %333 = vrcp.f32 %v58_v13  ;;  %v171_v54 = vmul.f32 %v151_v40, %v151_v40  ;;  %v193_v56 = vsel %vm185_vm0, %v169_v41, 0.0  ;;  %v153_v57 = vsub.f32 %v301_v46, %v321_v47  ;;  %v324_v13 = vld [vmem:[%s662_s1 + $0x10] sm:$0x1]  ;;  %v328_v38 = vld [vmem:[%s662_s1 + $0x14] sm:$0x1] }
  0x17   :  { %v90_v26 = vadd.f32 1e-06, %v89_v18  ;;  %v190_v51 = vadd.f32 %v189_v45, %v188_v44  ;;  %v195_v62 = vsel %vm185_vm0, %v170_v48, 0.0  ;;  %v154_v63 = vsub.f32 %v302_v52, %v322_v53  ;;  %v310_v40 = vld [vmem:[%s663_s0 + $0x1b] sm:$0x1] }
  0x18   :  { %v172_v4 = vmul.f32 %v152_v50, %v152_v50  ;;  %v197_v14 = vsel %vm185_vm0, %v171_v54, 0.0  ;;  %v155_v18 = vsub.f32 %v303_v60, %v323_v61  ;;  %v173_v20 = vmul.f32 %v153_v57, %v153_v57  ;;  %v311_v43 = vld [vmem:[%s663_s0 + $0x1c] sm:$0x1]  ;;  %v312_v44 = vld [vmem:[%s663_s0 + $0x1d] sm:$0x1] }
  0x19   :  { %335 = vrcp.f32 %v90_v26  ;;  %v192_v58 = vadd.f32 %v191_v49, %v190_v51  ;;  %v156_v24 = vsub.f32 %v304_v12, %v324_v13  ;;  %v174_v26 = vmul.f32 %v154_v63, %v154_v63  ;;  %v330_v45 = vld [vmem:[%s662_s1 + $0x16] sm:$0x1]  ;;  %v331_v48 = vld [vmem:[%s662_s1 + $0x17] sm:$0x1]  ;;  %v332_v49 = vld [vmem:[%s662_s1 + $0x18] sm:$0x1] }
  0x1a   :  { %337 = vrsqrt.f32 %v368_v1  ;;  %v199_v28 = vsel %vm185_vm0, %v172_v4, 0.0  ;;  %v175_v35 = vmul.f32 %v155_v18, %v155_v18  ;;  %v201_v36 = vsel %vm185_vm0, %v173_v20, 0.0  ;;  %v601_v60 = vld [vmem:[%s662_s1 + $0x4] sm:$0x1] }
  0x1b   :  { %v194_v7 = vadd.f32 %v193_v56, %v192_v58  ;;  %339 = vrsqrt.f32 %v378_v3  ;;  %v176_v41 = vmul.f32 %v156_v24, %v156_v24  ;;  %v203_v42 = vsel %vm185_vm0, %v174_v26, 0.0 }
  0x1c   :  { %v159_v46 = vsub.f32 %v307_v32, %v327_v33  ;;  %v205_v52 = vsel %vm185_vm0, %v175_v35, 0.0  ;;  %v162_v56 = vsub.f32 %v310_v40, %v330_v45  ;;  %v163_v61 = vsub.f32 %v311_v43, %v331_v48 }
  0x1d   :  { %v196_v21 = vadd.f32 %v195_v62, %v194_v7  ;;  %v207_v58 = vsel %vm185_vm0, %v176_v41, 0.0  ;;  %v164_v62 = vsub.f32 %v312_v44, %v332_v49 }
  0x1e   :  { %v179_v7 = vmul.f32 %v159_v46, %v159_v46  ;;  %v182_v20 = vmul.f32 %v162_v56, %v162_v56 }
  0x1f   :  { %v198_v27 = vadd.f32 %v197_v14, %v196_v21  ;;  %v184_v24 = vmul.f32 %v164_v62, %v164_v62 }
  0x21   :  { %v200_v39 = vadd.f32 %v199_v28, %v198_v27 }
  0x23   :  { %v334_v59 = vpop.eup %333  ;;  %v202_v47 = vadd.f32 %v201_v36, %v200_v39  ;;  %v291_v36 = vld [vmem:[%s663_s0 + $0x9] sm:$0x1] }
  0x24   :  { %v60_v8 = vmul.f32 %v334_v59, %v438_v55  ;;  %v305_v55 = vld [vmem:[%s663_s0 + $0x16] sm:$0x1] }
  0x25   :  { %v157_v34 = vsub.f32 %v305_v55, %v325_v23  ;;  %v204_v54 = vadd.f32 %v203_v42, %v202_v47  ;;  %v183_v23 = vmul.f32 %v163_v61, %v163_v61  ;;  %v219_v42 = vsel %vm185_vm0, %v182_v20, 0.0 }
  0x26   :  { %v336_v15 = vpop.eup %335 }
  0x27   :  { %v92_v22 = vmul.f32 %v336_v15, %v453_v5  ;;  %v306_v5 = vld [vmem:[%s663_s0 + $0x17] sm:$0x1]  ;;  %v177_v51 = vmul.f32 %v157_v34, %v157_v34  ;;  %v338_v59 = vpop.eup %337  ;;  %v206_v63 = vadd.f32 %v205_v52, %v204_v54  ;;  %v221_v48 = vsel %vm185_vm0, %v183_v23, 0.0 }
  0x28   :  { %v340_v4 = vpop.eup %339  ;;  %v244_v55 = vmul.f32 %v338_v59, %v368_v1 }
  0x29   :  { %vm534_vm1 = vcmp.gt.f32.partialorder %v92_v22, %v60_v8  ;;  %v209_v12 = vsel %vm185_vm0, %v177_v51, 0.0  ;;  %v208_v18 = vadd.f32 %v207_v58, %v206_v63  ;;  %v225_v22 = vsub.f32 1.0, %v601_v60 }
  0x2a   :  { %v548_v31 = vsel %vm534_vm1, %v416_v17, %v397_v10  ;;  %v561_v37 = vsel %vm534_vm1, %v421_v19, %v402_v11  ;;  %v308_v10 = vld [vmem:[%s663_s0 + $0x19] sm:$0x1]  ;;  %v309_v17 = vld [vmem:[%s663_s0 + $0x1a] sm:$0x1]  ;;  %v329_v11 = vld [vmem:[%s662_s1 + $0x15] sm:$0x1]  ;;  %v158_v19 = vsub.f32 %v306_v5, %v326_v30  ;;  %v94_v13 = vsel %vm534_vm1, %v411_v16, %v385_v6 }
  0x2b   :  { %341 = vrsqrt.f32 %v548_v31  ;;  %v160_v50 = vsub.f32 %v308_v10, %v328_v38  ;;  %v161_v53 = vsub.f32 %v309_v17, %v329_v11  ;;  %v95_v14 = vsel %vm534_vm1, %v430_v25, %v392_v9  ;;  %v292_v10 = vld [vmem:[%s663_s0 + $0x4] sm:$0x1] }
  0x2c   :  { %343 = vrsqrt.f32 %v561_v37  ;;  %v178_v57 = vmul.f32 %v158_v19, %v158_v19  ;;  %v210_v26 = vadd.f32 %v209_v12, %v208_v18  ;;  %v261_v27 = vmul.f32 %v340_v4, %v378_v3 }
  0x2d   :  { %v180_v8 = vmul.f32 %v160_v50, %v160_v50  ;;  %v181_v15 = vmul.f32 %v161_v53, %v161_v53  ;;  %v213_v6 = vsel %vm185_vm0, %v179_v7, 0.0  ;;  %v231_v16 = vsub.f32 %v94_v13, %v363_v0 }
  0x2e   :  { %v211_v21 = vsel %vm185_vm0, %v178_v57, 0.0  ;;  %v233_v9 = vsub.f32 %v95_v14, %v373_v2  ;;  %v248_v30 = vand.u32 2147483648, %v368_v1  ;;  %v246_v32 = vsel %vm245_vm2, %v368_v1, %v244_v55 }
  0x2f   :  { %v212_v25 = vadd.f32 %v211_v21, %v210_v26  ;;  %v215_v28 = vsel %vm185_vm0, %v180_v8, 0.0  ;;  %v217_v5 = vsel %vm185_vm0, %v181_v15, 0.0  ;;  %v265_v0 = vand.u32 2147483648, %v378_v3 }
  0x30   :  { %vm238_vm6 = vcmp.eq.f32.partialorder %v548_v31, inf  ;;  %v241_v34 = vand.u32 2147483648, %v548_v31  ;;  %v263_v35 = vsel %vm262_vm3, %v378_v3, %v261_v27  ;;  %v232_v17 = vmul.f32 %v231_v16, %v231_v16 }
  0x31   :  { %v214_v33 = vadd.f32 %v213_v6, %v212_v25  ;;  %v234_v38 = vmul.f32 %v233_v9, %v233_v9  ;;  %vm240_vm7 = vcmp.eq.f32.partialorder %v548_v31, 0.0  ;;  %v249_v19 = vsel %vm247_vm4, %v248_v30, %v246_v32 }
  0x32   :  { %vm255_vm8 = vcmp.eq.f32.partialorder %v561_v37, inf  ;;  %v258_v41 = vand.u32 2147483648, %v561_v37  ;;  %vm257_vm9 = vcmp.eq.f32.partialorder %v561_v37, 0.0  ;;  %v102_v45 = vsel %vm534_vm1, %v291_v36, %v292_v10 }
  0x33   :  { %v216_v11 = vadd.f32 %v215_v28, %v214_v33  ;;  %v266_v1 = vsel %vm264_vm5, %v265_v0, %v263_v35  ;;  %v235_v49 = vadd.f32 %v234_v38, %v232_v17  ;;  %v226_v53 = vmul.f32 0.5, %v225_v22 }
  0x34   :  { %v228_v54 = vsub.f32 %v601_v60, %v102_v45  ;;  %v223_v58 = vsel %vm185_vm0, %v184_v24, 0.0 }
  0x35   :  { %v218_v46 = vadd.f32 %v217_v5, %v216_v11  ;;  %v227_v62 = vadd.f32 %v601_v60, %v226_v53 }
  0x36   :  { %v229_v63 = vmul.f32 %v228_v54, %v228_v54 }
  0x37   :  { %v220_v52 = vadd.f32 %v219_v42, %v218_v46 }
  0x38   :  { %v342_v2 = vpop.eup %341  ;;  %v230_v8 = vmul.f32 %v229_v63, %v227_v62 }
  0x39   :  { %v237_v39 = vmul.f32 %v342_v2, %v548_v31  ;;  %v344_v40 = vpop.eup %343  ;;  %v222_v29 = vadd.f32 %v221_v48, %v220_v52 }
  0x3a   :  { %v254_v44 = vmul.f32 %v344_v40, %v561_v37 }
  0x3b   :  { %v239_v43 = vsel %vm238_vm6, %v548_v31, %v237_v39  ;;  %v224_v3 = vadd.f32 %v223_v58, %v222_v29 }
  0x3c   :  { %v242_v47 = vsel %vm240_vm7, %v241_v34, %v239_v43  ;;  %v256_v51 = vsel %vm255_vm8, %v561_v37, %v254_v44 }
  0x3d   :  { %v250_v50 = vsub.f32 %v242_v47, %v249_v19  ;;  %v259_v31 = vsel %vm257_vm9, %v258_v41, %v256_v51 }
  0x3e   :  { %v267_v57 = vsub.f32 %v259_v31, %v266_v1 }
  0x3f   :  { %v251_v56 = vmul.f32 %v250_v50, %v250_v50 }
  0x40   :  { %v268_v61 = vmul.f32 %v267_v57, %v267_v57 }
  0x41   :  { %v252_v59 = vadd.f32 %v251_v56, %v235_v49 }
  0x43   :  { %v269_v4 = vadd.f32 %v268_v61, %v252_v59 }
  0x45   :  { %v270_v7 = vmul.f32 5.0, %v269_v4 }
  0x47   :  { %v271_v37 = vadd.f32 %v270_v7, %v224_v3 }
  0x49   :  { %v272_v12 = vmul.f32 %v601_v60, %v271_v37 }
  0x4b   :  { %v273_v13 = vadd.f32 %v272_v12, %v230_v8 }
  0x4d   :  { %275 = vst [vmem:[%s664_s2] sm:$0x1] %v273_v13 }

</bundles_post_ra>
